<compile_context>
chip_gen: v5e
topology: v5e:2x2
jax: 0.10.0
libtpu: 0.0.40
codegen_flags: <defaults>
</compile_context>

<pallas_src>
import jax
import jax.numpy as jnp
from jax.experimental import pallas as pl
from jax.experimental.pallas import tpu as pltpu

LANE = 128
SUBLANE = 8


def _round_up(n, m):
    return ((n + m - 1) // m) * m


def _leaky_relu(x, slope=0.2):
    # f32 VPU select; slope folded as a constant multiply.
    return jnp.where(x > 0, x, slope * x)


def generator_kernel(x_ref,
                     w1_ref, b1_ref,
                     w2_ref, b2_ref,
                     w3_ref, b3_ref,
                     w4_ref, b4_ref,
                     o_ref):
    """Fused 4-layer MLP on one batch tile.

    bf16 MXU matmuls with f32 accumulation; bias add + LeakyReLU on the VPU
    in f32, then cast back to bf16 only to feed the next MXU matmul.
    """
    h = x_ref[...]  # bf16 [TM, noise_dim]

    h = jnp.dot(h, w1_ref[...], preferred_element_type=jnp.float32) + b1_ref[...]
    h = _leaky_relu(h).astype(jnp.bfloat16)

    h = jnp.dot(h, w2_ref[...], preferred_element_type=jnp.float32) + b2_ref[...]
    h = _leaky_relu(h).astype(jnp.bfloat16)

    h = jnp.dot(h, w3_ref[...], preferred_element_type=jnp.float32) + b3_ref[...]
    h = _leaky_relu(h).astype(jnp.bfloat16)

    h = jnp.dot(h, w4_ref[...], preferred_element_type=jnp.float32) + b4_ref[...]

    o_ref[...] = h.astype(o_ref.dtype)


def generator_forward(x, params, *, tile_m=128):
    """x: [B, noise_dim] float32; params: dict of f32 (w, b) pairs.

    tile_m: batch tile (MXU row dim). 128 is a good default for v5e; 256 maps
    well onto the 2x256 MXU of v6e/v7x. Small batches shrink the tile (min 8
    sublanes) so tiny inputs don't pay for a full 128-row tile.
    """
    B, noise_dim = x.shape
    in_size = params["w4"].shape[1]

    # --- Lane-dense output: pad final layer to a multiple of 128 features ---
    out_pad = _round_up(in_size, LANE)
    w4 = params["w4"]
    b4 = params["b4"]
    if out_pad != in_size:
        w4 = jnp.pad(w4, ((0, 0), (0, out_pad - in_size)))
        b4 = jnp.pad(b4, ((0, 0), (0, out_pad - in_size)))

    # --- bf16 weights for the MXU; biases stay f32 for the f32 epilogue ---
    w1 = params["w1"].astype(jnp.bfloat16)
    w2 = params["w2"].astype(jnp.bfloat16)
    w3 = params["w3"].astype(jnp.bfloat16)
    w4 = w4.astype(jnp.bfloat16)
    b1, b2, b3 = params["b1"], params["b2"], params["b3"]

    # --- Batch tiling: pad B to a multiple of the tile (tile >= 8 sublanes) ---
    tm = min(tile_m, _round_up(B, SUBLANE))
    b_pad = _round_up(B, tm)
    x_bf16 = x.astype(jnp.bfloat16)
    if b_pad != B:
        x_bf16 = jnp.pad(x_bf16, ((0, b_pad - B), (0, 0)))

    args = (x_bf16, w1, b1, w2, b2, w3, b3, w4, b4)

    def tile_map(i):   # batch-tiled arrays walk along the grid
        return (i, 0)

    def const_map(i):  # weights/biases: same block every step -> VMEM-resident
        return (0, 0)

    in_specs = [pl.BlockSpec((tm, noise_dim), tile_map)]
    for a in args[1:]:
        in_specs.append(pl.BlockSpec(a.shape, const_map))
    out_spec = pl.BlockSpec((tm, out_pad), tile_map)

    flops = 2 * b_pad * (noise_dim * 128 + 128 * 256 + 256 * 512 + 512 * out_pad)
    bytes_accessed = (sum(int(a.size) * a.dtype.itemsize for a in args)
                      + b_pad * out_pad * 4)
    cost = pl.CostEstimate(flops=flops, transcendentals=0,
                           bytes_accessed=bytes_accessed)

    out = pl.pallas_call(
        generator_kernel,
        out_shape=jax.ShapeDtypeStruct((b_pad, out_pad), jnp.float32),
        grid=(b_pad // tm,),
        in_specs=in_specs,
        out_specs=out_spec,
        compiler_params=pltpu.CompilerParams(
            dimension_semantics=("parallel",),  # v7x megacore shards batch
        ),
        cost_estimate=cost,
    )(*args)

    return out[:B, :in_size]


def init_generator_params(key, noise_dim, in_size):
    """Deterministic synthetic init matching nn.Linear shapes (f32 master).

    PyTorch Linear(in, out) has weight [out, in]; we store the transpose
    [in, out] so the kernel does x @ W. Biases kept 2D ([1, out]) so they map
    cleanly onto TPU (sublane, lane) tiles."""
    dims = [(noise_dim, 128), (128, 256), (256, 512), (512, in_size)]
    params = {}
    keys = jax.random.split(key, len(dims) * 2)
    for i, (fin, fout) in enumerate(dims):
        bound = 1.0 / jnp.sqrt(fin)
        w = jax.random.uniform(keys[2 * i], (fin, fout), jnp.float32, -bound, bound)
        b = jax.random.uniform(keys[2 * i + 1], (1, fout), jnp.float32, -bound, bound)
        params[f"w{i + 1}"] = w
        params[f"b{i + 1}"] = b
    return params


def generator_reference(x, params):
    """Pure-JAX f32 reference of the PyTorch forward for correctness checking."""
    h = x
    for i in range(1, 5):
        h = h @ params[f"w{i}"] + params[f"b{i}"]
        if i < 4:
            h = jnp.where(h > 0, h, 0.2 * h)
    return h


if __name__ == "__main__":
    key = jax.random.PRNGKey(0)
    k_x, k_p = jax.random.split(key)

    batch = 8
    noise_dim = 32
    in_size = 64  # e.g. a flattened 8x8 image

    x = jax.random.normal(k_x, (batch, noise_dim), jnp.float32)
    params = init_generator_params(k_p, noise_dim, in_size)

    out = generator_forward(x, params)
    out = jax.block_until_ready(out)

    ref = generator_reference(x, params)
    assert out.shape == (batch, in_size)
    # bf16 MXU operands with f32 accumulation: loosen tolerance vs f32 reference.
    assert jnp.allclose(out, ref, atol=5e-2, rtol=5e-2), (
        f"mismatch vs reference, max abs diff={float(jnp.max(jnp.abs(out - ref)))}")

    print("KERNEL_OK")
</pallas_src>

<mosaic_0001>
module attributes {stable_mosaic.version = 11 : i64} {
  func.func @generator_kernel(%arg0: i32, %arg1: memref<8x32xbf16, #tpu.memory_space<vmem>>, %arg2: memref<32x128xbf16, #tpu.memory_space<vmem>>, %arg3: memref<1x128xf32, #tpu.memory_space<vmem>>, %arg4: memref<128x256xbf16, #tpu.memory_space<vmem>>, %arg5: memref<1x256xf32, #tpu.memory_space<vmem>>, %arg6: memref<256x512xbf16, #tpu.memory_space<vmem>>, %arg7: memref<1x512xf32, #tpu.memory_space<vmem>>, %arg8: memref<512x128xbf16, #tpu.memory_space<vmem>>, %arg9: memref<1x128xf32, #tpu.memory_space<vmem>>, %arg10: memref<8x128xf32, #tpu.memory_space<vmem>>) attributes {dimension_semantics = [#tpu.dimension_semantics<parallel>], iteration_bounds = array<i64: 1>, scalar_prefetch = 0 : i64, scratch_operands = 0 : i64, tpu.core_type = #tpu.core_type<tc>, window_params = [{transform_indices = @transform_0, window_bounds = array<i64: 8, 32>}, {pipeline_mode = #tpu.pipeline_mode<synchronous>, transform_indices = @transform_1, window_bounds = array<i64: 32, 128>}, {pipeline_mode = #tpu.pipeline_mode<synchronous>, transform_indices = @transform_2, window_bounds = array<i64: 1, 128>}, {pipeline_mode = #tpu.pipeline_mode<synchronous>, transform_indices = @transform_3, window_bounds = array<i64: 128, 256>}, {pipeline_mode = #tpu.pipeline_mode<synchronous>, transform_indices = @transform_4, window_bounds = array<i64: 1, 256>}, {pipeline_mode = #tpu.pipeline_mode<synchronous>, transform_indices = @transform_5, window_bounds = array<i64: 256, 512>}, {pipeline_mode = #tpu.pipeline_mode<synchronous>, transform_indices = @transform_6, window_bounds = array<i64: 1, 512>}, {pipeline_mode = #tpu.pipeline_mode<synchronous>, transform_indices = @transform_7, window_bounds = array<i64: 512, 128>}, {pipeline_mode = #tpu.pipeline_mode<synchronous>, transform_indices = @transform_8, window_bounds = array<i64: 1, 128>}, {transform_indices = @transform_9, window_bounds = array<i64: 8, 128>}]} {
    %c0 = arith.constant 0 : index
    %c0_0 = arith.constant 0 : index
    %0 = vector.load %arg1[%c0, %c0_0] : memref<8x32xbf16, #tpu.memory_space<vmem>>, vector<8x32xbf16>
    %c0_1 = arith.constant 0 : index
    %c0_2 = arith.constant 0 : index
    %1 = vector.load %arg2[%c0_1, %c0_2] : memref<32x128xbf16, #tpu.memory_space<vmem>>, vector<32x128xbf16>
    %cst = arith.constant dense<0.000000e+00> : vector<8x128xf32>
    %2 = tpu.matmul %0, %1, %cst {dimension_numbers = #tpu.dot_dimension_numbers<[1], [0], [0], [1], [0, 0, 1, 1], [], []>} : vector<8x32xbf16>, vector<32x128xbf16>, vector<8x128xf32> -> vector<8x128xf32>
    %c0_3 = arith.constant 0 : index
    %c0_4 = arith.constant 0 : index
    %3 = vector.load %arg3[%c0_3, %c0_4] : memref<1x128xf32, #tpu.memory_space<vmem>>, vector<1x128xf32>
    %4 = vector.broadcast %3 : vector<1x128xf32> to vector<8x128xf32>
    %5 = arith.addf %2, %4 : vector<8x128xf32>
    %cst_5 = arith.constant 0.000000e+00 : f32
    %6 = vector.broadcast %cst_5 : f32 to vector<8x128xf32>
    %7 = arith.cmpf ogt, %5, %6 : vector<8x128xf32>
    %cst_6 = arith.constant 2.000000e-01 : f32
    %8 = vector.broadcast %cst_6 : f32 to vector<8x128xf32>
    %9 = arith.mulf %8, %5 : vector<8x128xf32>
    %10 = arith.select %7, %5, %9 : vector<8x128xi1>, vector<8x128xf32>
    %11 = arith.truncf %10 : vector<8x128xf32> to vector<8x128xbf16>
    %c0_7 = arith.constant 0 : index
    %c0_8 = arith.constant 0 : index
    %12 = vector.load %arg4[%c0_7, %c0_8] : memref<128x256xbf16, #tpu.memory_space<vmem>>, vector<128x256xbf16>
    %cst_9 = arith.constant dense<0.000000e+00> : vector<8x256xf32>
    %13 = tpu.matmul %11, %12, %cst_9 {dimension_numbers = #tpu.dot_dimension_numbers<[1], [0], [0], [1], [0, 0, 1, 1], [], []>} : vector<8x128xbf16>, vector<128x256xbf16>, vector<8x256xf32> -> vector<8x256xf32>
    %c0_10 = arith.constant 0 : index
    %c0_11 = arith.constant 0 : index
    %14 = vector.load %arg5[%c0_10, %c0_11] : memref<1x256xf32, #tpu.memory_space<vmem>>, vector<1x256xf32>
    %15 = vector.broadcast %14 : vector<1x256xf32> to vector<8x256xf32>
    %16 = arith.addf %13, %15 : vector<8x256xf32>
    %cst_12 = arith.constant 0.000000e+00 : f32
    %17 = vector.broadcast %cst_12 : f32 to vector<8x256xf32>
    %18 = arith.cmpf ogt, %16, %17 : vector<8x256xf32>
    %cst_13 = arith.constant 2.000000e-01 : f32
    %19 = vector.broadcast %cst_13 : f32 to vector<8x256xf32>
    %20 = arith.mulf %19, %16 : vector<8x256xf32>
    %21 = arith.select %18, %16, %20 : vector<8x256xi1>, vector<8x256xf32>
    %22 = arith.truncf %21 : vector<8x256xf32> to vector<8x256xbf16>
    %c0_14 = arith.constant 0 : index
    %c0_15 = arith.constant 0 : index
    %23 = vector.load %arg6[%c0_14, %c0_15] : memref<256x512xbf16, #tpu.memory_space<vmem>>, vector<256x512xbf16>
    %cst_16 = arith.constant dense<0.000000e+00> : vector<8x512xf32>
    %24 = tpu.matmul %22, %23, %cst_16 {dimension_numbers = #tpu.dot_dimension_numbers<[1], [0], [0], [1], [0, 0, 1, 1], [], []>} : vector<8x256xbf16>, vector<256x512xbf16>, vector<8x512xf32> -> vector<8x512xf32>
    %c0_17 = arith.constant 0 : index
    %c0_18 = arith.constant 0 : index
    %25 = vector.load %arg7[%c0_17, %c0_18] : memref<1x512xf32, #tpu.memory_space<vmem>>, vector<1x512xf32>
    %26 = vector.broadcast %25 : vector<1x512xf32> to vector<8x512xf32>
    %27 = arith.addf %24, %26 : vector<8x512xf32>
    %cst_19 = arith.constant 0.000000e+00 : f32
    %28 = vector.broadcast %cst_19 : f32 to vector<8x512xf32>
    %29 = arith.cmpf ogt, %27, %28 : vector<8x512xf32>
    %cst_20 = arith.constant 2.000000e-01 : f32
    %30 = vector.broadcast %cst_20 : f32 to vector<8x512xf32>
    %31 = arith.mulf %30, %27 : vector<8x512xf32>
    %32 = arith.select %29, %27, %31 : vector<8x512xi1>, vector<8x512xf32>
    %33 = arith.truncf %32 : vector<8x512xf32> to vector<8x512xbf16>
    %c0_21 = arith.constant 0 : index
    %c0_22 = arith.constant 0 : index
    %34 = vector.load %arg8[%c0_21, %c0_22] : memref<512x128xbf16, #tpu.memory_space<vmem>>, vector<512x128xbf16>
    %cst_23 = arith.constant dense<0.000000e+00> : vector<8x128xf32>
    %35 = tpu.matmul %33, %34, %cst_23 {dimension_numbers = #tpu.dot_dimension_numbers<[1], [0], [0], [1], [0, 0, 1, 1], [], []>} : vector<8x512xbf16>, vector<512x128xbf16>, vector<8x128xf32> -> vector<8x128xf32>
    %c0_24 = arith.constant 0 : index
    %c0_25 = arith.constant 0 : index
    %36 = vector.load %arg9[%c0_24, %c0_25] : memref<1x128xf32, #tpu.memory_space<vmem>>, vector<1x128xf32>
    %37 = vector.broadcast %36 : vector<1x128xf32> to vector<8x128xf32>
    %38 = arith.addf %35, %37 : vector<8x128xf32>
    %c0_26 = arith.constant 0 : index
    %c0_27 = arith.constant 0 : index
    %39 = vector.load %arg10[%c0_26, %c0_27] : memref<8x128xf32, #tpu.memory_space<vmem>>, vector<8x128xf32>
    tpu.vector_store %arg10[%c0_26, %c0_27], %38 {strides = array<i32>} : memref<8x128xf32, #tpu.memory_space<vmem>>, vector<8x128xf32>,
    return
  }
  func.func @transform_0(%arg0: i32) -> (i32, i32) {
    %c0_i32 = arith.constant 0 : i32
    %c0_i32_0 = arith.constant 0 : i32
    return %arg0, %c0_i32 : i32, i32
  }
  func.func @transform_1(%arg0: i32) -> (i32, i32) {
    %c0_i32 = arith.constant 0 : i32
    %c0_i32_0 = arith.constant 0 : i32
    %c0_i32_1 = arith.constant 0 : i32
    return %c0_i32, %c0_i32_0 : i32, i32
  }
  func.func @transform_2(%arg0: i32) -> (i32, i32) {
    %c0_i32 = arith.constant 0 : i32
    %c0_i32_0 = arith.constant 0 : i32
    %c0_i32_1 = arith.constant 0 : i32
    return %c0_i32, %c0_i32_0 : i32, i32
  }
  func.func @transform_3(%arg0: i32) -> (i32, i32) {
    %c0_i32 = arith.constant 0 : i32
    %c0_i32_0 = arith.constant 0 : i32
    %c0_i32_1 = arith.constant 0 : i32
    return %c0_i32, %c0_i32_0 : i32, i32
  }
  func.func @transform_4(%arg0: i32) -> (i32, i32) {
    %c0_i32 = arith.constant 0 : i32
    %c0_i32_0 = arith.constant 0 : i32
    %c0_i32_1 = arith.constant 0 : i32
    return %c0_i32, %c0_i32_0 : i32, i32
  }
  func.func @transform_5(%arg0: i32) -> (i32, i32) {
    %c0_i32 = arith.constant 0 : i32
    %c0_i32_0 = arith.constant 0 : i32
    %c0_i32_1 = arith.constant 0 : i32
    return %c0_i32, %c0_i32_0 : i32, i32
  }
  func.func @transform_6(%arg0: i32) -> (i32, i32) {
    %c0_i32 = arith.constant 0 : i32
    %c0_i32_0 = arith.constant 0 : i32
    %c0_i32_1 = arith.constant 0 : i32
    return %c0_i32, %c0_i32_0 : i32, i32
  }
  func.func @transform_7(%arg0: i32) -> (i32, i32) {
    %c0_i32 = arith.constant 0 : i32
    %c0_i32_0 = arith.constant 0 : i32
    %c0_i32_1 = arith.constant 0 : i32
    return %c0_i32, %c0_i32_0 : i32, i32
  }
  func.func @transform_8(%arg0: i32) -> (i32, i32) {
    %c0_i32 = arith.constant 0 : i32
    %c0_i32_0 = arith.constant 0 : i32
    %c0_i32_1 = arith.constant 0 : i32
    return %c0_i32, %c0_i32_0 : i32, i32
  }
  func.func @transform_9(%arg0: i32) -> (i32, i32) {
    %c0_i32 = arith.constant 0 : i32
    %c0_i32_0 = arith.constant 0 : i32
    return %arg0, %c0_i32 : i32, i32
  }
}

</mosaic_0001>

<bundles_post_ra>
// kernel: tpu_custom_call.1
= control target key start
LH: loop header
LB: loop body
LE: loop exit
PB: predicated region body
PF: predicated region fallthrough
CT: control target
= control target key end

     0   :  { %14 = vsyncpa [#allocation3], 0  ;;  %s2012_s0 = inlined_call_operand.hbm [shape: bf16[8,32], index: 0, kind: input, shape index: {}]   ;;  %s2013_s1 = inlined_call_operand.hbm [shape: bf16[32,128], index: 1, kind: input, shape index: {}]   ;;  %s2014_s2 = inlined_call_operand.vmem [shape: f32[1,128], index: 2, kind: input, shape index: {}]   ;;  %s2015_s3 = inlined_call_operand.hbm [shape: bf16[128,256], index: 3, kind: input, shape index: {}]   ;;  %s2016_s4 = inlined_call_operand.hbm [shape: f32[1,256], index: 4, kind: input, shape index: {}]   ;;  %s2017_s5 = inlined_call_operand.hbm [shape: bf16[256,512], index: 5, kind: input, shape index: {}]   ;;  %s2018_s6 = inlined_call_operand.vmem [shape: f32[1,512], index: 6, kind: input, shape index: {}]   ;;  %s2019_s7 = inlined_call_operand.hbm [shape: bf16[512,128], index: 7, kind: input, shape index: {}]   ;;  %s2020_s8 = inlined_call_operand.vmem [shape: f32[1,128], index: 8, kind: input, shape index: {}]   ;;  %s2021_s9 = inlined_call_operand.hbm [shape: f32[8,128], index: 9, kind: output, shape index: {}]  }
   0x1   :  { %15 = vsyncpa [#allocation6], 0 }
   0x2   :  { %16 = vsyncpa [#allocation9], 0 }
   0x3   :  { %17 = vsyncpa [#allocation12], 0  ;;  %s34_s11 = sshll.u32 %s2013_s1, 4  ;;  %s35_s11 = int_to_ptr.hbm [resolvable:$true] %s34_s11 }
   0x4   :  { %18 = vsyncpa [#allocation4], 0  ;;  %s1913_s12 = smov [#allocation5]   ;;  %s63_s16 = sshll.u32 %s2016_s4, 4  ;;  %s64_s16 = int_to_ptr.hbm [resolvable:$true] %s63_s16 }
   0x5   :  { %s36_s13 = sshll.u32 %s1913_s12, 4  ;;  %s1914_s17 = smov 64   ;;  %s37_s13 = int_to_ptr.vmem [resolvable:$true] %s36_s13 }
   0x6   :  { %s1915_s18 = smov 4   ;;  %s1916_s19 = smov [#allocation8]  }
   0x7   :  { %42 = dma.hbm_to_vmem [thread:$0]  %s35_s11, 256, %s37_s13, [#allocation6], %s1914_s17, %s1914_s17, %s1915_s18  }
   0x8   :  { %s65_s20 = sshll.u32 %s1916_s19, 4  ;;  %s24_s22 = sshll.u32 %s2012_s0, 4  ;;  %s66_s20 = int_to_ptr.vmem [resolvable:$true] %s65_s20  ;;  %s25_s22 = int_to_ptr.hbm [resolvable:$true] %s24_s22 }
   0x9   :  { %68 = dma.hbm_to_vmem [thread:$0]  %s64_s16, 32, %s66_s20, [#allocation9]  }
   0xa   :  { %s49_s4 = sshll.u32 %s2015_s3, 4  ;;  %s1917_s25 = smov [#allocation2]   ;;  %s50_s4 = int_to_ptr.hbm [resolvable:$true] %s49_s4 }
   0xb   :  { %s26_s26 = sshll.u32 %s1917_s25, 4  ;;  %s1918_s27 = smov [#allocation7]   ;;  %s27_s26 = int_to_ptr.vmem [resolvable:$true] %s26_s26 }
   0xc   :  { %29 = dma.hbm_to_vmem [thread:$0]  %s25_s22, 64, %s27_s26, [#allocation3]  }
   0xd   :  { %s51_s28 = sshll.u32 %s1918_s27, 4  ;;  %s1919_s29 = smov 128   ;;  %s52_s28 = int_to_ptr.vmem [resolvable:$true] %s51_s28 }
   0xe   :  { %s1920_s30 = smov 8   ;;  %s73_s11 = sshll.u32 %s2017_s5, 4  ;;  %s74_s11 = int_to_ptr.hbm [resolvable:$true] %s73_s11 }
   0xf   :  { %57 = dma.hbm_to_vmem [thread:$0]  %s50_s4, 2048, %s52_s28, [#allocation6], %s1919_s29, %s1919_s29, %s1920_s30  }
  0x10   :  { %s1921_s12 = smov [#allocation10]   ;;  %s88_s15 = sshll.u32 %s2019_s7, 4  ;;  %s89_s15 = int_to_ptr.hbm [resolvable:$true] %s88_s15 }
  0x11   :  { %s75_s13 = sshll.u32 %s1921_s12, 4  ;;  %s1922_s16 = smov 256   ;;  %s76_s13 = int_to_ptr.vmem [resolvable:$true] %s75_s13 }
  0x12   :  { %s1923_s19 = smov 16   ;;  %s1924_s20 = smov [#allocation11]  }
  0x13   :  { %81 = dma.hbm_to_vmem [thread:$0]  %s74_s11, 8192, %s76_s13, [#allocation9], %s1922_s16, %s1922_s16, %s1923_s19  }
  0x14   :  { %s90_s21 = sshll.u32 %s1924_s20, 4  ;;  %s91_s21 = int_to_ptr.vmem [resolvable:$true] %s90_s21 }
  0x15   :  { %96 = dma.hbm_to_vmem [thread:$0]  %s89_s15, 4096, %s91_s21, [#allocation12], %s1914_s17, %s1914_s17, %s1915_s18  }
  0x16   :  { %1903 = dma.done.wait [#allocation3], 64  }
  0x17   :  { %1904 = vsyncadd [#allocation3], 4294967232 }
  0x18   :  { %1905 = dma.done.wait [#allocation6], 2304  }
  0x19   :  { %1906 = vsyncadd [#allocation6], 4294964992 }
  0x1a   :  { %1907 = dma.done.wait [#allocation9], 8224  }
  0x1b   :  { %1908 = vsyncadd [#allocation9], 4294959072 }
  0x1c   :  { %1909 = dma.done.wait [#allocation12], 4096  }
  0x1d   :  { %1910 = vsyncadd [#allocation12], 4294963200  ;;  %v1607_v0 = vld [vmem:[#allocation5 + $0x8] sm:$0xff]  ;;  %v1606_v1 = vld [vmem:[#allocation5] sm:$0xff]  ;;  %vm145_vm0 = vcmask 261120   ;;  %s1925_s1 = smov [#allocation13]  }
  0x1e   :  { %v1216_v2 = vld [vmem:[#allocation7 + $0x70] sm:$0xf]  ;;  %v1623_v3 = vld [vmem:[#allocation7 + $0x74] sm:$0xf0]  ;;  %v1622_v4 = vld [vmem:[#allocation7 + $0x74] sm:$0xf]  ;;  %155 = vmatpush.bf16.msra.mxu0 %v1607_v0 }
  0x1f   :  { %v1217_v5 = vor.u32 %v1623_v3, %v1216_v2  ;;  %v1218_v6 = vld [vmem:[#allocation7 + $0x78] sm:$0xf0]  ;;  %v1208_v7 = vld [vmem:[#allocation7 + $0x60] sm:$0xf]  ;;  %v1621_v8 = vld [vmem:[#allocation7 + $0x64] sm:$0xf0] }
  0x20   :  { %v1221_v9 = vor.u32 %v1622_v4, %v1218_v6  ;;  %v1620_v10 = vld [vmem:[#allocation7 + $0x64] sm:$0xf]  ;;  %v1210_v11 = vld [vmem:[#allocation7 + $0x68] sm:$0xf0]  ;;  %v1209_v12 = vor.u32 %v1621_v8, %v1208_v7  ;;  %v1200_v14 = vld [vmem:[#allocation7 + $0x50] sm:$0xf] }
  0x21   :  { %268 = vmatpush.bf16.msra.mxu1 %v1217_v5  ;;  %v1213_v13 = vor.u32 %v1620_v10, %v1210_v11  ;;  %v1619_v15 = vld [vmem:[#allocation7 + $0x54] sm:$0xf0]  ;;  %v124_v16 = vld [vmem:[#allocation2] sm:$0xf]  ;;  %v1618_v17 = vld [vmem:[#allocation7 + $0x54] sm:$0xf] }
  0x22   :  { %281 = vmatpush.bf16.msra.mxu2 %v1221_v9  ;;  %156 = vmatpush.bf16.msra.mxu0 %v1606_v1  ;;  %v1202_v18 = vld [vmem:[#allocation7 + $0x58] sm:$0xf0]  ;;  %v1201_v19 = vor.u32 %v1619_v15, %v1200_v14  ;;  %v1192_v20 = vld [vmem:[#allocation7 + $0x40] sm:$0xf]  ;;  %v1617_v22 = vld [vmem:[#allocation7 + $0x44] sm:$0xf0] }
  0x23   :  { %v1205_v21 = vor.u32 %v1618_v17, %v1202_v18  ;;  %v1616_v23 = vld [vmem:[#allocation7 + $0x44] sm:$0xf]  ;;  %v1194_v24 = vld [vmem:[#allocation7 + $0x48] sm:$0xf0]  ;;  %v1193_v25 = vor.u32 %v1617_v22, %v1192_v20  ;;  %v1184_v27 = vld [vmem:[#allocation7 + $0x30] sm:$0xf] }
  0x24   :  { %v1197_v26 = vor.u32 %v1616_v23, %v1194_v24  ;;  %v1615_v28 = vld [vmem:[#allocation7 + $0x34] sm:$0xf0]  ;;  %v1614_v29 = vld [vmem:[#allocation7 + $0x34] sm:$0xf]  ;;  %v1186_v30 = vld [vmem:[#allocation7 + $0x38] sm:$0xf0] }
  0x25   :  { %269 = vmatpush.bf16.msra.mxu1 %v1209_v12  ;;  %1157 = vmatmul.msk.bf16.vlgmr.msra.gmra.mxu0 %vm145_vm0, %v124_v16  ;;  %v1185_v31 = vor.u32 %v1615_v28, %v1184_v27  ;;  %v1189_v32 = vor.u32 %v1614_v29, %v1186_v30  ;;  %v1176_v33 = vld [vmem:[#allocation7 + $0x20] sm:$0xf]  ;;  %v1613_v34 = vld [vmem:[#allocation7 + $0x24] sm:$0xf0]  ;;  %v1612_v35 = vld [vmem:[#allocation7 + $0x24] sm:$0xf] }
  0x26   :  { %282 = vmatpush.bf16.msra.mxu2 %v1213_v13  ;;  %v1178_v36 = vld [vmem:[#allocation7 + $0x28] sm:$0xf0]  ;;  %v1177_v37 = vor.u32 %v1613_v34, %v1176_v33  ;;  %v1168_v39 = vld [vmem:[#allocation7 + $0x10] sm:$0xf]  ;;  %v1611_v40 = vld [vmem:[#allocation7 + $0x14] sm:$0xf0] }
  0x27   :  { %v1181_v38 = vor.u32 %v1612_v35, %v1178_v36  ;;  %v1610_v41 = vld [vmem:[#allocation7 + $0x14] sm:$0xf]  ;;  %v1169_v42 = vor.u32 %v1611_v40, %v1168_v39  ;;  %v1170_v43 = vld [vmem:[#allocation7 + $0x18] sm:$0xf0]  ;;  %v1160_v45 = vld [vmem:[#allocation7] sm:$0xf] }
  0x28   :  { %v1173_v44 = vor.u32 %v1610_v41, %v1170_v43  ;;  %v1609_v46 = vld [vmem:[#allocation7 + $0x4] sm:$0xf0]  ;;  %v1608_v47 = vld [vmem:[#allocation7 + $0x4] sm:$0xf]  ;;  %v1162_v49 = vld [vmem:[#allocation7 + $0x8] sm:$0xf0] }
  0x29   :  { %270 = vmatpush.bf16.msra.mxu1 %v1201_v19  ;;  %v1161_v48 = vor.u32 %v1609_v46, %v1160_v45  ;;  %v1165_v50 = vor.u32 %v1608_v47, %v1162_v49  ;;  %v1336_v51 = vld [vmem:[#allocation10 + $0xe0] sm:$0xf]  ;;  %v1654_v52 = vld [vmem:[#allocation10 + $0xec] sm:$0xf0]  ;;  %v1652_v53 = vld [vmem:[#allocation10 + $0xe4] sm:$0xf] }
  0x2a   :  { %283 = vmatpush.bf16.msra.mxu2 %v1205_v21  ;;  %v1337_v54 = vor.u32 %v1654_v52, %v1336_v51  ;;  %v1338_v55 = vld [vmem:[#allocation10 + $0xf0] sm:$0xf0]  ;;  %v1320_v56 = vld [vmem:[#allocation10 + $0xc0] sm:$0xf]  ;;  %v1650_v57 = vld [vmem:[#allocation10 + $0xcc] sm:$0xf0] }
  0x2b   :  { %v1341_v58 = vor.u32 %v1652_v53, %v1338_v55  ;;  %v1648_v59 = vld [vmem:[#allocation10 + $0xc4] sm:$0xf]  ;;  %v1322_v60 = vld [vmem:[#allocation10 + $0xd0] sm:$0xf0]  ;;  %v1464_v61 = vld [vmem:[#allocation10 + $0x1e0] sm:$0xf]  ;;  %v1321_v62 = vor.u32 %v1650_v57, %v1320_v56 }
  0x2c   :  { %696 = vmatpush.bf16.msra.mxu3 %v1337_v54  ;;  %v1686_v63 = vld [vmem:[#allocation10 + $0x1ec] sm:$0xf0]  ;;  %v1684_v0 = vld [vmem:[#allocation10 + $0x1e4] sm:$0xf]  ;;  %v1466_v1 = vld [vmem:[#allocation10 + $0x1f0] sm:$0xf0]  ;;  %v1325_v2 = vor.u32 %v1648_v59, %v1322_v60 }
  0x2d   :  { %271 = vmatpush.bf16.msra.mxu1 %v1193_v25  ;;  %v1465_v3 = vor.u32 %v1686_v63, %v1464_v61  ;;  %v1469_v4 = vor.u32 %v1684_v0, %v1466_v1  ;;  %v1304_v5 = vld [vmem:[#allocation10 + $0xa0] sm:$0xf]  ;;  %v1646_v6 = vld [vmem:[#allocation10 + $0xac] sm:$0xf0]  ;;  %v1644_v7 = vld [vmem:[#allocation10 + $0xa4] sm:$0xf] }
  0x2e   :  { %284 = vmatpush.bf16.msra.mxu2 %v1197_v26  ;;  %v1306_v8 = vld [vmem:[#allocation10 + $0xb0] sm:$0xf0]  ;;  %v1448_v9 = vld [vmem:[#allocation10 + $0x1c0] sm:$0xf]  ;;  %v1682_v10 = vld [vmem:[#allocation10 + $0x1cc] sm:$0xf0]  ;;  %v1305_v14 = vor.u32 %v1646_v6, %v1304_v5 }
  0x2f   :  { %709 = vmatpush.bf16.msrb.mxu0 %v1465_v3  ;;  %v1449_v11 = vor.u32 %v1682_v10, %v1448_v9  ;;  %v1680_v12 = vld [vmem:[#allocation10 + $0x1c4] sm:$0xf]  ;;  %v1450_v13 = vld [vmem:[#allocation10 + $0x1d0] sm:$0xf0]  ;;  %v1288_v16 = vld [vmem:[#allocation10 + $0x80] sm:$0xf]  ;;  %v1309_v18 = vor.u32 %v1644_v7, %v1306_v8 }
  0x30   :  { %697 = vmatpush.bf16.msra.mxu3 %v1321_v62  ;;  %v1453_v15 = vor.u32 %v1680_v12, %v1450_v13  ;;  %v1642_v17 = vld [vmem:[#allocation10 + $0x8c] sm:$0xf0]  ;;  %v1432_v19 = vld [vmem:[#allocation10 + $0x1a0] sm:$0xf]  ;;  %v1676_v21 = vld [vmem:[#allocation10 + $0x1a4] sm:$0xf] }
  0x31   :  { %272 = vmatpush.bf16.msra.mxu1 %v1185_v31  ;;  %v1678_v20 = vld [vmem:[#allocation10 + $0x1ac] sm:$0xf0]  ;;  %v1640_v22 = vld [vmem:[#allocation10 + $0x84] sm:$0xf]  ;;  %v1290_v23 = vld [vmem:[#allocation10 + $0x90] sm:$0xf0]  ;;  %v1289_v28 = vor.u32 %v1642_v17, %v1288_v16 }
  0x32   :  { %285 = vmatpush.bf16.msra.mxu2 %v1189_v32  ;;  %v1434_v24 = vld [vmem:[#allocation10 + $0x1b0] sm:$0xf0]  ;;  %v1433_v25 = vor.u32 %v1678_v20, %v1432_v19  ;;  %v1416_v27 = vld [vmem:[#allocation10 + $0x180] sm:$0xf]  ;;  %v1674_v29 = vld [vmem:[#allocation10 + $0x18c] sm:$0xf0]  ;;  %v1293_v32 = vor.u32 %v1640_v22, %v1290_v23 }
  0x33   :  { %710 = vmatpush.bf16.msrb.mxu0 %v1449_v11  ;;  %v1437_v26 = vor.u32 %v1676_v21, %v1434_v24  ;;  %v1672_v30 = vld [vmem:[#allocation10 + $0x184] sm:$0xf]  ;;  %v1418_v31 = vld [vmem:[#allocation10 + $0x190] sm:$0xf0]  ;;  %v1272_v33 = vld [vmem:[#allocation10 + $0x60] sm:$0xf] }
  0x34   :  { %698 = vmatpush.bf16.msra.mxu3 %v1305_v14  ;;  %v1638_v34 = vld [vmem:[#allocation10 + $0x6c] sm:$0xf0]  ;;  %v1636_v35 = vld [vmem:[#allocation10 + $0x64] sm:$0xf]  ;;  %v1274_v36 = vld [vmem:[#allocation10 + $0x70] sm:$0xf0] }
  0x35   :  { %273 = vmatpush.bf16.msra.mxu1 %v1177_v37  ;;  %v1417_v37 = vor.u32 %v1674_v29, %v1416_v27  ;;  %v1400_v39 = vld [vmem:[#allocation10 + $0x160] sm:$0xf]  ;;  %v1273_v40 = vor.u32 %v1638_v34, %v1272_v33  ;;  %v1670_v41 = vld [vmem:[#allocation10 + $0x16c] sm:$0xf0]  ;;  %v1402_v43 = vld [vmem:[#allocation10 + $0x170] sm:$0xf0] }
  0x36   :  { %286 = vmatpush.bf16.msra.mxu2 %v1181_v38  ;;  %v1421_v38 = vor.u32 %v1672_v30, %v1418_v31  ;;  %v1256_v45 = vld [vmem:[#allocation10 + $0x40] sm:$0xf]  ;;  %v1634_v46 = vld [vmem:[#allocation10 + $0x4c] sm:$0xf0]  ;;  %v1632_v47 = vld [vmem:[#allocation10 + $0x44] sm:$0xf]  ;;  %v1401_v49 = vor.u32 %v1670_v41, %v1400_v39 }
  0x37   :  { %711 = vmatpush.bf16.msrb.mxu0 %v1433_v25  ;;  %v1384_v51 = vld [vmem:[#allocation10 + $0x140] sm:$0xf]  ;;  %v1257_v52 = vor.u32 %v1634_v46, %v1256_v45  ;;  %v1666_v53 = vld [vmem:[#allocation10 + $0x14c] sm:$0xf0]  ;;  %v1664_v54 = vld [vmem:[#allocation10 + $0x144] sm:$0xf] }
  0x38   :  { %699 = vmatpush.bf16.msra.mxu3 %v1289_v28  ;;  %v1386_v55 = vld [vmem:[#allocation10 + $0x150] sm:$0xf0]  ;;  %v1240_v57 = vld [vmem:[#allocation10 + $0x20] sm:$0xf]  ;;  %v1733_v59 = vld [vmem:[%s2014_s2] ss:$0 sm:$0xff]  ;;  %v1385_v62 = vor.u32 %v1666_v53, %v1384_v51 }
  0x39   :  { %274 = vmatpush.bf16.msra.mxu1 %v1169_v42  ;;  %v1668_v42 = vld [vmem:[#allocation10 + $0x164] sm:$0xf]  ;;  %v1242_v61 = vld [vmem:[#allocation10 + $0x30] sm:$0xf0]  ;;  %v1389_v63 = vor.u32 %v1664_v54, %v1386_v55  ;;  %v1224_v0 = vld [vmem:[#allocation10] sm:$0xf] }
  0x3a   :  { %287 = vmatpush.bf16.msra.mxu2 %v1173_v44  ;;  %v1277_v44 = vor.u32 %v1636_v35, %v1274_v36  ;;  %v1628_v60 = vld [vmem:[#allocation10 + $0x24] sm:$0xf]  ;;  %v1368_v1 = vld [vmem:[#allocation10 + $0x120] sm:$0xf]  ;;  %v1662_v3 = vld [vmem:[#allocation10 + $0x12c] sm:$0xf0] }
  0x3b   :  { %712 = vmatpush.bf16.msrb.mxu0 %v1417_v37  ;;  %v1370_v5 = vld [vmem:[#allocation10 + $0x130] sm:$0xf0]  ;;  %v1245_v7 = vor.u32 %v1628_v60, %v1242_v61  ;;  %v1626_v8 = vld [vmem:[#allocation10 + $0xc] sm:$0xf0]  ;;  %v1624_v9 = vld [vmem:[#allocation10 + $0x4] sm:$0xf]  ;;  %v1369_v16 = vor.u32 %v1662_v3, %v1368_v1 }
  0x3c   :  { %700 = vmatpush.bf16.msra.mxu3 %v1273_v40  ;;  %v1226_v10 = vld [vmem:[#allocation10 + $0x10] sm:$0xf0]  ;;  %v1344_v12 = vld [vmem:[#allocation10 + $0xe8] sm:$0xf]  ;;  %v1655_v13 = vld [vmem:[#allocation10 + $0xf4] sm:$0xf0]  ;;  %v1225_v21 = vor.u32 %v1626_v8, %v1224_v0 }
  0x3d   :  { %275 = vmatpush.bf16.msra.mxu1 %v1161_v48  ;;  %v1258_v48 = vld [vmem:[#allocation10 + $0x50] sm:$0xf0]  ;;  %v1653_v14 = vld [vmem:[#allocation10 + $0xec] sm:$0xf]  ;;  %v1658_v19 = vld [vmem:[#allocation10 + $0x10c] sm:$0xf0]  ;;  %v1229_v27 = vor.u32 %v1624_v9, %v1226_v10  ;;  %v1345_v28 = vor.u32 %v1655_v13, %v1344_v12 }
  0x3e   :  { %288 = vmatpush.bf16.msra.mxu2 %v1165_v50  ;;  %v1405_v50 = vor.u32 %v1668_v42, %v1402_v43  ;;  %v1261_v56 = vor.u32 %v1632_v47, %v1258_v48  ;;  %v1656_v22 = vld [vmem:[#allocation10 + $0x104] sm:$0xf]  ;;  %v1354_v23 = vld [vmem:[#allocation10 + $0x110] sm:$0xf0]  ;;  %v1472_v24 = vld [vmem:[#allocation10 + $0x1e8] sm:$0xf] }
  0x3f   :  { %713 = vmatpush.bf16.msrb.mxu0 %v1401_v49  ;;  %v1687_v25 = vld [vmem:[#allocation10 + $0x1f4] sm:$0xf0]  ;;  %v1685_v29 = vld [vmem:[#allocation10 + $0x1ec] sm:$0xf]  ;;  %v1474_v30 = vld [vmem:[#allocation10 + $0x1f8] sm:$0xf0] }
  0x40   :  { %701 = vmatpush.bf16.msra.mxu3 %v1257_v52  ;;  %v1328_v33 = vld [vmem:[#allocation10 + $0xc8] sm:$0xf]  ;;  %v1651_v34 = vld [vmem:[#allocation10 + $0xd4] sm:$0xf0]  ;;  %v1649_v36 = vld [vmem:[#allocation10 + $0xcc] sm:$0xf]  ;;  %v1473_v39 = vor.u32 %v1687_v25, %v1472_v24  ;;  %v1477_v41 = vor.u32 %v1685_v29, %v1474_v30 }
  0x41   :  { %722 = vmatpush.bf16.msrb.mxu1 %v1341_v58  ;;  %v1630_v58 = vld [vmem:[#allocation10 + $0x2c] sm:$0xf0]  ;;  %v1330_v37 = vld [vmem:[#allocation10 + $0xd8] sm:$0xf0]  ;;  %v1329_v42 = vor.u32 %v1651_v34, %v1328_v33  ;;  %v1647_v45 = vld [vmem:[#allocation10 + $0xb4] sm:$0xf0] }
  0x42   :  { %735 = vmatpush.bf16.msrb.mxu2 %v1469_v4  ;;  %v1660_v4 = vld [vmem:[#allocation10 + $0x124] sm:$0xf]  ;;  %v1333_v43 = vor.u32 %v1649_v36, %v1330_v37  ;;  %v1645_v46 = vld [vmem:[#allocation10 + $0xac] sm:$0xf]  ;;  %v1314_v48 = vld [vmem:[#allocation10 + $0xb8] sm:$0xf0] }
  0x43   :  { %714 = vmatpush.bf16.msrb.mxu0 %v1385_v62  ;;  %v1373_v17 = vor.u32 %v1660_v4, %v1370_v5  ;;  %v1317_v49 = vor.u32 %v1645_v46, %v1314_v48  ;;  %v1683_v51 = vld [vmem:[#allocation10 + $0x1d4] sm:$0xf0]  ;;  %v1681_v52 = vld [vmem:[#allocation10 + $0x1cc] sm:$0xf]  ;;  %v1458_v54 = vld [vmem:[#allocation10 + $0x1d8] sm:$0xf0] }
  0x44   :  { %v1461_v55 = vor.u32 %v1681_v52, %v1458_v54  ;;  %v1298_v60 = vld [vmem:[#allocation10 + $0x98] sm:$0xf0]  ;;  %v1440_v62 = vld [vmem:[#allocation10 + $0x1a8] sm:$0xf]  ;;  %v1677_v0 = vld [vmem:[#allocation10 + $0x1ac] sm:$0xf] }
  0x45   :  { %723 = vmatpush.bf16.msrb.mxu1 %v1325_v2  ;;  %v1241_v2 = vor.u32 %v1630_v58, %v1240_v57  ;;  %v1643_v57 = vld [vmem:[#allocation10 + $0x94] sm:$0xf0]  ;;  %v1641_v58 = vld [vmem:[#allocation10 + $0x8c] sm:$0xf]  ;;  %v1280_v4 = vld [vmem:[#allocation10 + $0x68] sm:$0xf] }
  0x46   :  { %736 = vmatpush.bf16.msrb.mxu2 %v1453_v15  ;;  %v1346_v15 = vld [vmem:[#allocation10 + $0xf8] sm:$0xf0]  ;;  %v1301_v61 = vor.u32 %v1641_v58, %v1298_v60  ;;  %v1639_v5 = vld [vmem:[#allocation10 + $0x74] sm:$0xf0]  ;;  %v1424_v10 = vld [vmem:[#allocation10 + $0x188] sm:$0xf] }
  0x47   :  { %702 = vmatpush.bf16.msra.mxu3 %v1241_v2  ;;  %715 = vmatpush.bf16.msrb.mxu0 %v1369_v16  ;;  %v1442_v2 = vld [vmem:[#allocation10 + $0x1b8] sm:$0xf0]  ;;  %v1673_v12 = vld [vmem:[#allocation10 + $0x18c] sm:$0xf]  ;;  %v1264_v16 = vld [vmem:[#allocation10 + $0x48] sm:$0xf] }
  0x48   :  { %v1445_v3 = vor.u32 %v1677_v0, %v1442_v2  ;;  %v1282_v8 = vld [vmem:[#allocation10 + $0x78] sm:$0xf0]  ;;  %v1669_v24 = vld [vmem:[#allocation10 + $0x16c] sm:$0xf]  ;;  %v1631_v29 = vld [vmem:[#allocation10 + $0x34] sm:$0xf0] }
  0x49   :  { %724 = vmatpush.bf16.msrb.mxu1 %v1309_v18  ;;  %v1352_v18 = vld [vmem:[#allocation10 + $0x100] sm:$0xf]  ;;  %v1629_v30 = vld [vmem:[#allocation10 + $0x2c] sm:$0xf]  ;;  %v1392_v33 = vld [vmem:[#allocation10 + $0x148] sm:$0xf] }
  0x4a   :  { %737 = vmatpush.bf16.msrb.mxu2 %v1437_v26  ;;  %v1353_v35 = vor.u32 %v1658_v19, %v1352_v18  ;;  %v1633_v18 = vld [vmem:[#allocation10 + $0x4c] sm:$0xf]  ;;  %v1667_v34 = vld [vmem:[#allocation10 + $0x154] sm:$0xf0]  ;;  %v1376_v46 = vld [vmem:[#allocation10 + $0x128] sm:$0xf] }
  0x4b   :  { %703 = vmatpush.bf16.msra.mxu3 %v1225_v21  ;;  %v1393_v36 = vor.u32 %v1667_v34, %v1392_v33  ;;  %v1665_v37 = vld [vmem:[#allocation10 + $0x14c] sm:$0xf]  ;;  %v1360_v52 = vld [vmem:[#allocation10 + $0x108] sm:$0xf]  ;;  %v1716_v33 = vld [vmem:[#allocation11 + $0xe0] sm:$0xff]  ;;  %s1134_s22 = sshll.u32 %s1925_s1, 4  ;;  %s1135_s22 = int_to_ptr.vmem [resolvable:$true] %s1134_s22 }
  0x4c   :  { %716 = vmatpush.bf16.msrb.mxu0 %v1353_v35  ;;  %v1661_v48 = vld [vmem:[#allocation10 + $0x12c] sm:$0xf]  ;;  %v1706_v34 = vld [vmem:[#allocation11 + $0x90] sm:$0xff]  ;;  %s1136_s4 = sshll.u32 %s2021_s9, 4  ;;  %s1137_s4 = int_to_ptr.hbm [resolvable:$true] %s1136_s4 }
  0x4d   :  { %725 = vmatpush.bf16.msrb.mxu1 %v1293_v32  ;;  %v1349_v32 = vor.u32 %v1653_v14, %v1346_v15  ;;  %v1426_v14 = vld [vmem:[#allocation10 + $0x198] sm:$0xf0]  ;;  %v1657_v54 = vld [vmem:[#allocation10 + $0x10c] sm:$0xf] }
  0x4e   :  { %738 = vmatpush.bf16.msrb.mxu2 %v1421_v38  ;;  %v1357_v38 = vor.u32 %v1656_v22, %v1354_v23  ;;  %v1429_v15 = vor.u32 %v1673_v12, %v1426_v14  ;;  %v1408_v22 = vld [vmem:[#allocation10 + $0x168] sm:$0xf]  ;;  %v1671_v23 = vld [vmem:[#allocation10 + $0x174] sm:$0xf0]  ;;  %v1692_v14 = vld [vmem:[#allocation11 + $0x20] sm:$0xff] }
  0x4f   :  { %748 = vmatpush.bf16.msrb.mxu3 %v1345_v28  ;;  %v1409_v25 = vor.u32 %v1671_v23, %v1408_v22  ;;  %v1248_v28 = vld [vmem:[#allocation10 + $0x28] sm:$0xf]  ;;  %v1719_v22 = vld [vmem:[#allocation11 + $0xf8] sm:$0xff] }
  0x50   :  { %761 = vmatpush.bf16.msra.mxu0 %v1473_v39  ;;  %v1232_v39 = vld [vmem:[#allocation10 + $0x8] sm:$0xf] }
  0x51   :  { %726 = vmatpush.bf16.msrb.mxu1 %v1277_v44  ;;  %v1312_v44 = vld [vmem:[#allocation10 + $0xa8] sm:$0xf] }
  0x52   :  { %739 = vmatpush.bf16.msrb.mxu2 %v1405_v50  ;;  %v1313_v47 = vor.u32 %v1647_v45, %v1312_v44  ;;  %v1456_v50 = vld [vmem:[#allocation10 + $0x1c8] sm:$0xf] }
  0x53   :  { %749 = vmatpush.bf16.msrb.mxu3 %v1329_v42  ;;  %v1457_v53 = vor.u32 %v1683_v51, %v1456_v50  ;;  %v1625_v42 = vld [vmem:[#allocation10 + $0xc] sm:$0xf]  ;;  %v1378_v50 = vld [vmem:[#allocation10 + $0x138] sm:$0xf0] }
  0x54   :  { %v1381_v51 = vor.u32 %v1661_v48, %v1378_v50  ;;  %v1689_v23 = vld [vmem:[#allocation11 + $0x8] sm:$0xff] }
  0x55   :  { %727 = vmatpush.bf16.msrb.mxu1 %v1261_v56  ;;  %v1296_v56 = vld [vmem:[#allocation10 + $0x88] sm:$0xf]  ;;  %762 = vmatpush.bf16.msra.mxu0 %v1457_v53  ;;  %v1659_v53 = vld [vmem:[#allocation10 + $0x114] sm:$0xf0] }
  0x56   :  { %740 = vmatpush.bf16.msrb.mxu2 %v1389_v63  ;;  %v1679_v63 = vld [vmem:[#allocation10 + $0x1b4] sm:$0xf0] }
  0x57   :  { %750 = vmatpush.bf16.msrb.mxu3 %v1313_v47  ;;  %v1441_v1 = vor.u32 %v1679_v63, %v1440_v62  ;;  %v1663_v47 = vld [vmem:[#allocation10 + $0x134] sm:$0xf0] }
  0x59   :  { %728 = vmatpush.bf16.msrb.mxu1 %v1245_v7  ;;  %763 = vmatpush.bf16.msra.mxu0 %v1441_v1  ;;  %v1281_v7 = vor.u32 %v1639_v5, %v1280_v4  ;;  %v1695_v1 = vld [vmem:[#allocation11 + $0x38] sm:$0xff] }
  0x5a   :  { %741 = vmatpush.bf16.msrb.mxu2 %v1373_v17  ;;  %v1635_v17 = vld [vmem:[#allocation10 + $0x54] sm:$0xf0] }
  0x5b   :  { %v1265_v19 = vor.u32 %v1635_v17, %v1264_v16  ;;  %v1691_v16 = vld [vmem:[#allocation11 + $0x18] sm:$0xff]  ;;  %v1700_v17 = vld [vmem:[#allocation11 + $0x60] sm:$0xff] }
  0x5d   :  { %729 = vmatpush.bf16.msrb.mxu1 %v1229_v27 }
  0x5e   :  { %742 = vmatpush.bf16.msrb.mxu2 %v1357_v38  ;;  %v1394_v38 = vld [vmem:[#allocation10 + $0x158] sm:$0xf0] }
  0xa2   :  { %v158_v6 = vpop.f32.mrf.mxu0 }
  0xa3   :  { %v159_v11 = vadd.f32 %v1733_v59, %v158_v6  ;;  %v1297_v59 = vor.u32 %v1643_v57, %v1296_v56  ;;  %v1637_v6 = vld [vmem:[#allocation10 + $0x6c] sm:$0xf]  ;;  %v1362_v56 = vld [vmem:[#allocation10 + $0x118] sm:$0xf0] }
  0xa4   :  { %v1285_v9 = vor.u32 %v1637_v6, %v1282_v8  ;;  %v182_v57 = vld [vmem:[#allocation8] sm:$0x3]  ;;  %v1365_v58 = vor.u32 %v1657_v54, %v1362_v56 }
  0xa5   :  { %v163_v20 = vmul.f32 0.2, %v159_v11  ;;  %vm162_vm1 = vcmp.gt.f32.partialorder %v159_v11, 0.0  ;;  %751 = vmatpush.bf16.msrb.mxu3 %v1297_v59  ;;  %v184_v59 = vperm.slane %v182_v57, 0  ;;  %v185_v63 = vperm.slane %v182_v57, 1 }
  0xa7   :  { %v164_v26 = vsel %vm162_vm1, %v159_v11, %v163_v20  ;;  %v1675_v11 = vld [vmem:[#allocation10 + $0x194] sm:$0xf0]  ;;  %v1266_v20 = vld [vmem:[#allocation10 + $0x58] sm:$0xf0] }
  0xa8   :  { %v165_v31 = vpack.c.bf16 %v164_v26, %v164_v26  ;;  %v1425_v13 = vor.u32 %v1675_v11, %v1424_v10  ;;  %v1269_v21 = vor.u32 %v1633_v18, %v1266_v20  ;;  %v1410_v26 = vld [vmem:[#allocation10 + $0x178] sm:$0xf0]  ;;  %v1693_v11 = vld [vmem:[#allocation11 + $0x28] sm:$0xff] }
  0xa9   :  { %752 = vmatpush.bf16.msrb.mxu3 %v1281_v7  ;;  %v1413_v27 = vor.u32 %v1669_v24, %v1410_v26  ;;  %v1694_v7 = vld [vmem:[#allocation11 + $0x30] sm:$0xff]  ;;  %v1711_v18 = vld [vmem:[#allocation11 + $0xb8] sm:$0xff] }
  0xaa   :  { %v160_v40 = vpop.f32.mrf.mxu0  ;;  %276 = vmatmul.bf16.vlgmr.msra.gmra.mxu1 %v165_v31  ;;  %289 = vmatmul.bf16.vlgmr.msra.gmra.mxu2 %v165_v31  ;;  %v1249_v31 = vor.u32 %v1631_v29, %v1248_v28  ;;  %v1699_v20 = vld [vmem:[#allocation11 + $0x58] sm:$0xff]  ;;  %v1698_v24 = vld [vmem:[#allocation11 + $0x50] sm:$0xff]  ;;  %v1697_v28 = vld [vmem:[#allocation11 + $0x48] sm:$0xff] }
  0xab   :  { %774 = vmatpush.bf16.msra.mxu1 %v1349_v32  ;;  %787 = vmatpush.bf16.msra.mxu2 %v1477_v41  ;;  %v1250_v32 = vld [vmem:[#allocation10 + $0x38] sm:$0xf0]  ;;  %v1397_v40 = vor.u32 %v1665_v37, %v1394_v38  ;;  %v1627_v41 = vld [vmem:[#allocation10 + $0x14] sm:$0xf0]  ;;  %v1718_v26 = vld [vmem:[#allocation11 + $0xf0] sm:$0xff] }
  0xac   :  { %764 = vmatpush.bf16.msra.mxu0 %v1425_v13  ;;  %v1253_v35 = vor.u32 %v1629_v30, %v1250_v32  ;;  %v1233_v44 = vor.u32 %v1627_v41, %v1232_v39  ;;  %v1702_v13 = vld [vmem:[#allocation11 + $0x70] sm:$0xff]  ;;  %v1708_v29 = vld [vmem:[#allocation11 + $0xa0] sm:$0xff]  ;;  %v1717_v30 = vld [vmem:[#allocation11 + $0xe8] sm:$0xff] }
  0xad   :  { %753 = vmatpush.bf16.msrb.mxu3 %v1265_v19  ;;  %v1690_v19 = vld [vmem:[#allocation11 + $0x10] sm:$0xff]  ;;  %v1707_v32 = vld [vmem:[#allocation11 + $0x98] sm:$0xff]  ;;  %v1704_v38 = vld [vmem:[#allocation11 + $0x80] sm:$0xff] }
  0xae   :  { %v1714_v37 = vld [vmem:[#allocation11 + $0xd0] sm:$0xff]  ;;  %v1713_v39 = vld [vmem:[#allocation11 + $0xc8] sm:$0xff] }
  0xaf   :  { %775 = vmatpush.bf16.msra.mxu1 %v1333_v43  ;;  %788 = vmatpush.bf16.msra.mxu2 %v1461_v55  ;;  %v1234_v43 = vld [vmem:[#allocation10 + $0x18] sm:$0xf0]  ;;  %v1361_v55 = vor.u32 %v1659_v53, %v1360_v52 }
  0xb0   :  { %765 = vmatpush.bf16.msra.mxu0 %v1409_v25  ;;  %v1237_v45 = vor.u32 %v1625_v42, %v1234_v43  ;;  %v1709_v25 = vld [vmem:[#allocation11 + $0xa8] sm:$0xff] }
  0xb1   :  { %754 = vmatpush.bf16.msrb.mxu3 %v1249_v31  ;;  %v1696_v31 = vld [vmem:[#allocation11 + $0x40] sm:$0xff]  ;;  %v366_v42 = vld [vmem:[%s2018_s6] sm:$0xf] }
  0xb2   :  { %v368_v43 = vperm.slane %v366_v42, 0 }
  0xb3   :  { %776 = vmatpush.bf16.msra.mxu1 %v1317_v49  ;;  %789 = vmatpush.bf16.msra.mxu2 %v1445_v3  ;;  %v1377_v49 = vor.u32 %v1663_v47, %v1376_v46  ;;  %v369_v46 = vperm.slane %v366_v42, 1 }
  0xb4   :  { %766 = vmatpush.bf16.msra.mxu0 %v1393_v36  ;;  %v1705_v36 = vld [vmem:[#allocation11 + $0x88] sm:$0xff] }
  0xb5   :  { %755 = vmatpush.bf16.msrb.mxu3 %v1233_v44 }
  0xb7   :  { %777 = vmatpush.bf16.msra.mxu1 %v1301_v61  ;;  %790 = vmatpush.bf16.msra.mxu2 %v1429_v15  ;;  %v1701_v15 = vld [vmem:[#allocation11 + $0x68] sm:$0xff] }
  0xb8   :  { %767 = vmatpush.bf16.msra.mxu0 %v1377_v49 }
  0xbb   :  { %778 = vmatpush.bf16.msra.mxu1 %v1285_v9  ;;  %791 = vmatpush.bf16.msra.mxu2 %v1413_v27  ;;  %v1703_v9 = vld [vmem:[#allocation11 + $0x78] sm:$0xff]  ;;  %v1688_v27 = vld [vmem:[#allocation11] sm:$0xff] }
  0xbc   :  { %768 = vmatpush.bf16.msra.mxu0 %v1361_v55 }
  0xbf   :  { %779 = vmatpush.bf16.msra.mxu1 %v1269_v21  ;;  %792 = vmatpush.bf16.msra.mxu2 %v1397_v40  ;;  %v1710_v21 = vld [vmem:[#allocation11 + $0xb0] sm:$0xff]  ;;  %v1712_v40 = vld [vmem:[#allocation11 + $0xc0] sm:$0xff] }
  0xc3   :  { %780 = vmatpush.bf16.msra.mxu1 %v1253_v35  ;;  %793 = vmatpush.bf16.msra.mxu2 %v1381_v51  ;;  %v1715_v35 = vld [vmem:[#allocation11 + $0xd8] sm:$0xff] }
  0xc7   :  { %781 = vmatpush.bf16.msra.mxu1 %v1237_v45  ;;  %794 = vmatpush.bf16.msra.mxu2 %v1365_v58 }
 0x127   :  { %v277_v60 = vpop.f32.mrf.mxu1 }
 0x128   :  { %v278_v61 = vadd.f32 %v277_v60, %v184_v59 }
 0x12a   :  { %vm294_vm2 = vcmp.gt.f32.partialorder %v278_v61, 0.0  ;;  %v296_v62 = vmul.f32 0.2, %v278_v61 }
 0x12c   :  { %v298_v0 = vsel %vm294_vm2, %v278_v61, %v296_v62  ;;  %v370_v62 = vperm.slane %v366_v42, 2 }
 0x12d   :  { %v300_v2 = vpack.c.bf16 %v298_v0, %v298_v0  ;;  %v290_v3 = vpop.f32.mrf.mxu2 }
 0x12e   :  { %v291_v4 = vadd.f32 %v290_v3, %v185_v63 }
 0x12f   :  { %v279_v5 = vpop.f32.mrf.mxu1  ;;  %704 = vmatmul.bf16.vlgmr.msra.gmra.mxu3 %v300_v2  ;;  %730 = vmatmul.bf16.vlgmr.msrb.gmra.mxu1 %v300_v2 }
 0x130   :  { %vm295_vm3 = vcmp.gt.f32.partialorder %v291_v4, 0.0  ;;  %v297_v6 = vmul.f32 0.2, %v291_v4  ;;  %1076 = vmatpush.bf16.msra.mxu3 %v1695_v1  ;;  %1102 = vmatpush.bf16.msrb.mxu1 %v1711_v18 }
 0x132   :  { %v299_v8 = vsel %vm295_vm3, %v291_v4, %v297_v6 }
 0x133   :  { %v301_v10 = vpack.c.bf16 %v299_v8, %v299_v8 }
 0x134   :  { %1077 = vmatpush.bf16.msra.mxu3 %v1694_v7  ;;  %1103 = vmatpush.bf16.msrb.mxu1 %v1710_v21 }
 0x135   :  { %v292_v12 = vpop.f32.mrf.mxu2  ;;  %717 = vmatmul.bf16.vlgmr.msrb.gmra.mxu0 %v301_v10  ;;  %743 = vmatmul.bf16.vlgmr.msrb.gmra.mxu2 %v301_v10 }
 0x136   :  { %1089 = vmatpush.bf16.msrb.mxu0 %v1703_v9  ;;  %1115 = vmatpush.bf16.msrb.mxu2 %v1719_v22  ;;  %v1734_v22 = vld [vmem:[%s2020_s8] ss:$0 sm:$0xff] }
 0x138   :  { %1078 = vmatpush.bf16.msra.mxu3 %v1693_v11  ;;  %1104 = vmatpush.bf16.msrb.mxu1 %v1709_v25 }
 0x13a   :  { %1090 = vmatpush.bf16.msrb.mxu0 %v1702_v13  ;;  %1116 = vmatpush.bf16.msrb.mxu2 %v1718_v26 }
 0x13c   :  { %1079 = vmatpush.bf16.msra.mxu3 %v1692_v14  ;;  %1105 = vmatpush.bf16.msrb.mxu1 %v1708_v29 }
 0x13e   :  { %1091 = vmatpush.bf16.msrb.mxu0 %v1701_v15  ;;  %1117 = vmatpush.bf16.msrb.mxu2 %v1717_v30 }
 0x13f   :  { %756 = vmatmul.bf16.vlgmr.msrb.gmra.mxu3 %v300_v2  ;;  %782 = vmatmul.bf16.vlgmr.msra.gmra.mxu1 %v300_v2  ;;  %v371_v2 = vperm.slane %v366_v42, 3 }
 0x140   :  { %1080 = vmatpush.bf16.msra.mxu3 %v1691_v16  ;;  %1106 = vmatpush.bf16.msrb.mxu1 %v1707_v32 }
 0x142   :  { %1092 = vmatpush.bf16.msrb.mxu0 %v1700_v17  ;;  %1118 = vmatpush.bf16.msrb.mxu2 %v1716_v33 }
 0x144   :  { %1081 = vmatpush.bf16.msra.mxu3 %v1690_v19  ;;  %1107 = vmatpush.bf16.msrb.mxu1 %v1706_v34 }
 0x145   :  { %769 = vmatmul.bf16.vlgmr.msra.gmra.mxu0 %v301_v10  ;;  %795 = vmatmul.bf16.vlgmr.msra.gmra.mxu2 %v301_v10 }
 0x146   :  { %1093 = vmatpush.bf16.msrb.mxu0 %v1699_v20  ;;  %1119 = vmatpush.bf16.msrb.mxu2 %v1715_v35 }
 0x148   :  { %1082 = vmatpush.bf16.msra.mxu3 %v1689_v23  ;;  %1108 = vmatpush.bf16.msrb.mxu1 %v1705_v36 }
 0x14a   :  { %1094 = vmatpush.bf16.msrb.mxu0 %v1698_v24  ;;  %1120 = vmatpush.bf16.msrb.mxu2 %v1714_v37 }
 0x14c   :  { %1083 = vmatpush.bf16.msra.mxu3 %v1688_v27  ;;  %1109 = vmatpush.bf16.msrb.mxu1 %v1704_v38 }
 0x14e   :  { %1095 = vmatpush.bf16.msrb.mxu0 %v1697_v28  ;;  %1121 = vmatpush.bf16.msrb.mxu2 %v1713_v39 }
 0x152   :  { %1096 = vmatpush.bf16.msrb.mxu0 %v1696_v31  ;;  %1122 = vmatpush.bf16.msrb.mxu2 %v1712_v40 }
 0x1ac   :  { %v731_v41 = vpop.f32.mrf.mxu1 }
 0x1ad   :  { %v732_v50 = vadd.f32 %v731_v41, %v369_v46 }
 0x1b2   :  { %v705_v44 = vpop.f32.mrf.mxu3  ;;  %v718_v45 = vpop.f32.mrf.mxu0 }
 0x1b3   :  { %v706_v47 = vadd.f32 %v705_v44, %v368_v43 }
 0x1b4   :  { %v733_v48 = vpop.f32.mrf.mxu1 }
 0x1b5   :  { %v719_v49 = vadd.f32 %v718_v45, %v706_v47 }
 0x1b7   :  { %vm800_vm4 = vcmp.gt.f32.partialorder %v719_v49, 0.0  ;;  %v804_v51 = vmul.f32 0.2, %v719_v49 }
 0x1b8   :  { %v744_v52 = vpop.f32.mrf.mxu2 }
 0x1b9   :  { %v808_v53 = vsel %vm800_vm4, %v719_v49, %v804_v51  ;;  %v745_v54 = vadd.f32 %v744_v52, %v732_v50 }
 0x1ba   :  { %v812_v55 = vpack.c.bf16 %v808_v53, %v808_v53  ;;  %v707_v56 = vpop.f32.mrf.mxu3  ;;  %v720_v57 = vpop.f32.mrf.mxu0 }
 0x1bb   :  { %vm801_vm5 = vcmp.gt.f32.partialorder %v745_v54, 0.0  ;;  %v805_v58 = vmul.f32 0.2, %v745_v54 }
 0x1bc   :  { %v783_v59 = vpop.f32.mrf.mxu1  ;;  %1084 = vmatmul.bf16.vlgmr.msra.gmra.mxu3 %v812_v55 }
 0x1bd   :  { %v809_v60 = vsel %vm801_vm5, %v745_v54, %v805_v58  ;;  %v784_v6 = vadd.f32 %v783_v59, %v371_v2 }
 0x1be   :  { %v813_v61 = vpack.c.bf16 %v809_v60, %v809_v60 }
 0x1c0   :  { %v746_v63 = vpop.f32.mrf.mxu2  ;;  %1097 = vmatmul.bf16.vlgmr.msrb.gmra.mxu0 %v813_v61 }
 0x1c2   :  { %v757_v0 = vpop.f32.mrf.mxu3  ;;  %v770_v1 = vpop.f32.mrf.mxu0 }
 0x1c3   :  { %v758_v3 = vadd.f32 %v757_v0, %v370_v62 }
 0x1c4   :  { %v785_v4 = vpop.f32.mrf.mxu1 }
 0x1c5   :  { %v771_v5 = vadd.f32 %v770_v1, %v758_v3 }
 0x1c7   :  { %vm802_vm6 = vcmp.gt.f32.partialorder %v771_v5, 0.0  ;;  %v806_v7 = vmul.f32 0.2, %v771_v5 }
 0x1c8   :  { %v796_v8 = vpop.f32.mrf.mxu2 }
 0x1c9   :  { %v810_v9 = vsel %vm802_vm6, %v771_v5, %v806_v7  ;;  %v797_v10 = vadd.f32 %v796_v8, %v784_v6 }
 0x1ca   :  { %v814_v11 = vpack.c.bf16 %v810_v9, %v810_v9  ;;  %v759_v12 = vpop.f32.mrf.mxu3  ;;  %v772_v13 = vpop.f32.mrf.mxu0 }
 0x1cb   :  { %vm803_vm7 = vcmp.gt.f32.partialorder %v797_v10, 0.0  ;;  %v807_v14 = vmul.f32 0.2, %v797_v10 }
 0x1cc   :  { %1110 = vmatmul.bf16.vlgmr.msrb.gmra.mxu1 %v814_v11 }
 0x1cd   :  { %v811_v15 = vsel %vm803_vm7, %v797_v10, %v807_v14 }
 0x1ce   :  { %v815_v16 = vpack.c.bf16 %v811_v15, %v811_v15 }
 0x1d0   :  { %v798_v17 = vpop.f32.mrf.mxu2  ;;  %1123 = vmatmul.bf16.vlgmr.msrb.gmra.mxu2 %v815_v16 }
 0x23d   :  { %v1098_v18 = vpop.f32.mrf.mxu0 }
 0x23f   :  { %v1085_v19 = vpop.f32.mrf.mxu3 }
 0x240   :  { %v1086_v24 = vadd.f32 %v1734_v22, %v1085_v19 }
 0x242   :  { %v1099_v25 = vadd.f32 %v1098_v18, %v1086_v24 }
 0x245   :  { %v1100_v20 = vpop.f32.mrf.mxu0 }
 0x247   :  { %v1087_v21 = vpop.f32.mrf.mxu3 }
 0x249   :  { %v1111_v23 = vpop.f32.mrf.mxu1 }
 0x24a   :  { %v1112_v27 = vadd.f32 %v1111_v23, %v1099_v25 }
 0x251   :  { %v1113_v26 = vpop.f32.mrf.mxu1 }
 0x253   :  { %v1124_v28 = vpop.f32.mrf.mxu2 }
 0x254   :  { %v1125_v29 = vadd.f32 %v1124_v28, %v1112_v27 }
 0x256   :  { %1128 = vst [vmem:[#allocation13] sm:$0xff] %v1125_v29 }
 0x257   :  { %1139 = dma.vmem_to_hbm [thread:$0]  %s1135_s22, 128, %s1137_s4, [#allocation4]  }
 0x25b   :  { %v1126_v30 = vpop.f32.mrf.mxu2 }
 0x25c   :  { %1911 = dma.done.wait [#allocation4], 128  }
 0x25d   :  { %1912 = vsyncadd [#allocation4], 4294967168 }
 0x25e   :  { %1144 = vsyncpa [#allocation3], 1 }
 0x25f   :  { %1145 = vsyncpa [#allocation6], 1 }
 0x260   :  { %1146 = vsyncpa [#allocation9], 1 }
 0x261   :  { %1147 = vsyncpa [#allocation12], 1 }
 0x262   :  { %1148 = vsyncpa [#allocation4], 1 }

</bundles_post_ra>
